<compile_context>
chip_gen: v7x
topology: tpu7x:2x2x1
jax: 0.10.0
libtpu: 0.0.40
codegen_flags: <defaults>
</compile_context>

<pallas_src>
import functools

import jax
import jax.numpy as jnp
from jax.experimental import pallas as pl
from jax.experimental.pallas import tpu as pltpu

_LANES = 128
_SUBLANES = 8


def _round_up(x, d):
    return (x + d - 1) // d * d


def _chip_budgets():
    """(logits_block_bytes, vmem_limit_bytes) tuned per TPU generation."""
    vmem_cap = None
    try:
        info = pltpu.get_tpu_info()
        vmem_cap = int(getattr(info, "vmem_capacity_bytes", 0)) or None
    except Exception:
        vmem_cap = None
    if vmem_cap is None:
        vmem_cap = 64 * 1024 * 1024          # conservative: assume v7x-sized VMEM
    if vmem_cap >= 96 * 1024 * 1024:         # v5e / v6e: 128 MiB physical VMEM
        return 8 * 1024 * 1024, 96 * 1024 * 1024
    return 6 * 1024 * 1024, 48 * 1024 * 1024  # v7x: 64 MiB per TensorCore


def _build_weight_slab(weights, w_block_bytes):
    """Flatten+concat every 'weight' tensor into a lane-dense (rows,128) slab.

    rows is padded to a multiple of the chosen weight-tile row count (zero
    padding contributes 0 to sum(w^2)).  Returns (slab2d, tile_w_rows).
    """
    if weights:
        arrs = [jnp.asarray(w) for w in weights]
        dtypes = {a.dtype for a in arrs}
        slab_dtype = next(iter(dtypes)) if len(dtypes) == 1 else jnp.float32
        flat = jnp.concatenate([jnp.ravel(a).astype(slab_dtype) for a in arrs])
    else:
        slab_dtype = jnp.float32
        flat = jnp.zeros((_LANES,), slab_dtype)

    itemsize = jnp.dtype(slab_dtype).itemsize
    align = 16 if itemsize == 2 else _SUBLANES
    rows_needed = _round_up(max(1, -(-flat.size // _LANES)), align)
    budget_rows = max(align, (w_block_bytes // (_LANES * itemsize)) // align * align)
    tile_w_rows = min(rows_needed, budget_rows)
    rows = _round_up(rows_needed, tile_w_rows)
    total = rows * _LANES
    if total != flat.size:
        flat = jnp.pad(flat, (0, total - flat.size))
    return flat.reshape(rows, _LANES), tile_w_rows


# ----------------------------------------------------------------------------
# Fused kernel: tiled cross-entropy sum + tiled sum-of-squares, partial out
# ----------------------------------------------------------------------------
def _loss_kernel(logits_ref, labels_ref, w_ref, out_ref, ce_acc, w_acc, *,
                 steps_per_core, n_ce_tiles, n_w_tiles, tile_n, n_valid,
                 inv_n, l2_scale):
    i = pl.program_id(1)                       # sequential tile step
    t = pl.program_id(0) * steps_per_core + i  # global tile index

    @pl.when(i == 0)
    def _init():
        ce_acc[...] = jnp.zeros_like(ce_acc)
        w_acc[...] = jnp.zeros_like(w_acc)

    @pl.when(t < n_ce_tiles)
    def _ce_tile():
        logits = logits_ref[...].astype(jnp.float32)                 # (tile_n, C)
        row_max = jnp.max(logits, axis=-1, keepdims=True)
        shifted = logits - row_max                                   # max cancels in lse - tgt
        lse = jnp.log(jnp.sum(jnp.exp(shifted), axis=-1, keepdims=True))   # (tile_n, 1)

        labels = labels_ref[...]                                     # (tile_n, 1) int32
        col = jax.lax.broadcasted_iota(jnp.int32, shifted.shape, 1)
        # select instead of float one-hot (out-of-range labels silently give 0)
        tgt = jnp.sum(jnp.where(col == labels, shifted, 0.0),
                      axis=-1, keepdims=True)                        # (tile_n, 1)
        per_ex = lse - tgt

        # mask batch-padding rows out of the sum
        row = t * tile_n + jax.lax.broadcasted_iota(jnp.int32, per_ex.shape, 0)
        per_ex = jnp.where(row < n_valid, per_ex, 0.0)
        # (tile_n,1) -> (1,1): sublane-only reduce per step
        ce_acc[...] += jnp.sum(per_ex, axis=0, keepdims=True)

    @pl.when(t < n_w_tiles)
    def _w_tile():
        w = w_ref[...].astype(jnp.float32)                           # (rows, 128)
        # sublane-only partial reduce; cross-lane reduce deferred to finalize
        w_acc[...] += jnp.sum(w * w, axis=0, keepdims=True)          # (1, 128)

    @pl.when(i == steps_per_core - 1)
    def _finalize():
        w_sum = jnp.sum(w_acc[...], axis=-1, keepdims=True)          # (1, 1)
        out_ref[...] = ce_acc[...] * inv_n + l2_scale * w_sum        # per-core partial


# ----------------------------------------------------------------------------
# Wrapper: padding, tiling, single pallas_call
# ----------------------------------------------------------------------------
def cross_entropy_l2_loss(y_pred, y_test, m, l2_ratio, *, weights=None,
                          weight_slab=None, weight_tile_rows=None,
                          num_parallel=2, block_bytes=None,
                          vmem_limit_bytes=None):
    y_pred = jnp.asarray(y_pred)
    n, c = y_pred.shape
    if n == 0:
        raise ValueError("cross_entropy_l2_loss: empty batch")

    chip_block, chip_vmem = _chip_budgets()
    block_bytes = chip_block if block_bytes is None else int(block_bytes)
    vmem_limit_bytes = chip_vmem if vmem_limit_bytes is None else int(vmem_limit_bytes)

    # ---- weight slab (cached by CrossEntropyL2; rebuilt here otherwise) -----
    if weight_slab is None:
        weight_slab, weight_tile_rows = _build_weight_slab(
            list(weights) if weights else [], block_bytes // 2)
    slab_rows = weight_slab.shape[0]
    if weight_tile_rows is None:
        weight_tile_rows = slab_rows
    assert slab_rows % weight_tile_rows == 0
    n_w_tiles = slab_rows // weight_tile_rows
    slab_elems = slab_rows * _LANES

    # ---- batch tiling: (tile_n, C) logits blocks, byte-budgeted --------------
    itemsize = y_pred.dtype.itemsize
    row_align = 16 if itemsize == 2 else _SUBLANES
    # real per-row VMEM footprint: lane-padded logits + lane-padded int32 label
    row_bytes = _round_up(c, _LANES) * itemsize + 4 * _LANES
    budget_rows = max(row_align,
                      (block_bytes // row_bytes) // row_align * row_align)
    tile_n = min(budget_rows, _round_up(n, row_align))
    n_pad = _round_up(n, tile_n)
    n_ce_tiles = n_pad // tile_n

    logits = y_pred
    labels = jnp.asarray(y_test).astype(jnp.int32).reshape(-1)
    if n_pad != n:
        logits = jnp.pad(logits, ((0, n_pad - n), (0, 0)))
        labels = jnp.pad(labels, (0, n_pad - n))
    labels2d = labels.reshape(n_pad, 1)

    # ---- grid: (parallel cores) x (sequential tiles); partials summed below --
    num_tiles = max(n_ce_tiles, n_w_tiles)
    num_parallel = max(1, int(num_parallel))
    spc = pl.cdiv(num_tiles, num_parallel)           # steps per core

    # Clamp the shorter operand's block index once its tiles run out (the
    # pl.when gates prevent double counting; refetch of the last block is cheap).
    def ce_map(cc, i):
        return (jnp.minimum(cc * spc + i, n_ce_tiles - 1), 0)

    def w_map(cc, i):
        return (jnp.minimum(cc * spc + i, n_w_tiles - 1), 0)

    kernel = functools.partial(
        _loss_kernel, steps_per_core=spc, n_ce_tiles=n_ce_tiles,
        n_w_tiles=n_w_tiles, tile_n=tile_n, n_valid=n,
        inv_n=1.0 / float(n), l2_scale=float(l2_ratio) / float(m) / 2.0)

    cost = pl.CostEstimate(
        flops=6 * n_pad * c + 2 * slab_elems,
        transcendentals=n_pad * c,
        bytes_accessed=(itemsize * n_pad * c + 4 * n_pad
                        + weight_slab.dtype.itemsize * slab_elems
                        + 4 * num_parallel))

    out = pl.pallas_call(
        kernel,
        out_shape=jax.ShapeDtypeStruct((num_parallel, 1, 1), jnp.float32),
        grid_spec=pltpu.PrefetchScalarGridSpec(
            num_scalar_prefetch=0,
            grid=(num_parallel, spc),
            in_specs=[
                pl.BlockSpec((tile_n, c), ce_map),                   # logits tiles
                pl.BlockSpec((tile_n, 1), ce_map),                   # labels per tile
                pl.BlockSpec((weight_tile_rows, _LANES), w_map),     # weight-slab tiles
            ],
            out_specs=pl.BlockSpec((pl.Squeezed(), 1, 1),
                                   lambda cc, i: (cc, 0, 0)),        # per-core partial
            scratch_shapes=[pltpu.VMEM((1, 1), jnp.float32),         # CE partial sum
                            pltpu.VMEM((1, _LANES), jnp.float32)],   # sum(w^2) lane partials
        ),
        compiler_params=pltpu.CompilerParams(
            dimension_semantics=("parallel", "arbitrary"),
            vmem_limit_bytes=vmem_limit_bytes),
        cost_estimate=cost,
    )(logits, labels2d, weight_slab)
    return jnp.sum(out[:, 0, 0])


# ----------------------------------------------------------------------------
# Module equivalent
# ----------------------------------------------------------------------------
class CrossEntropyL2:
    """JAX/Pallas equivalent of CrossEntropy_L2(model, m, l2_ratio).

    Notes:
      * The PyTorch module keeps accumulating into self.w across forward()
        calls; here the L2 term is computed fresh each call (first-call
        semantics).
      * The lane-dense weight slab is built once at construction and cached,
        so repeated calls do not re-pay the flatten/concat HBM traffic.
        Rebuild the object if the model weights change.
    """

    def __init__(self, model_state_dict, m, l2_ratio):
        self.weights = [v for k, v in model_state_dict.items() if "weight" in k]
        self.m = float(m)
        self.l2_ratio = float(l2_ratio)
        block_bytes, _ = _chip_budgets()
        self._slab, self._slab_tile_rows = _build_weight_slab(
            self.weights, block_bytes // 2)

    def __call__(self, y_pred, y_test):
        return cross_entropy_l2_loss(
            y_pred, y_test, self.m, self.l2_ratio,
            weight_slab=self._slab, weight_tile_rows=self._slab_tile_rows)


# ----------------------------------------------------------------------------
# Pure-JAX reference (sanity check)
# ----------------------------------------------------------------------------
def _reference(y_pred, y_test, weights, m, l2_ratio):
    logits = y_pred.astype(jnp.float32)
    lse = jax.scipy.special.logsumexp(logits, axis=-1)
    tgt = jnp.take_along_axis(logits, y_test[:, None].astype(jnp.int32), axis=-1)[:, 0]
    ce = jnp.mean(lse - tgt)
    w = sum(jnp.sum(jnp.square(wt.astype(jnp.float32))) for wt in weights)
    return ce + l2_ratio * w / m / 2.0


if __name__ == "__main__":
    key = jax.random.PRNGKey(0)
    k1, k2, k3, k4 = jax.random.split(key, 4)

    # small synthetic "model" (MLP): two Linear layers -> two 'weight' tensors
    hidden, in_dim, num_classes, batch = 32, 16, 10, 8
    state_dict = {
        "fc1.weight": jax.random.normal(k1, (hidden, in_dim), jnp.float32) * 0.1,
        "fc1.bias": jnp.zeros((hidden,), jnp.float32),
        "fc2.weight": jax.random.normal(k2, (num_classes, hidden), jnp.float32) * 0.1,
        "fc2.bias": jnp.zeros((num_classes,), jnp.float32),
    }

    m = 100.0
    l2_ratio = 1e-3

    y_pred = jax.random.normal(k3, (batch, num_classes), jnp.float32)
    y_test = jax.random.randint(k4, (batch,), 0, num_classes, jnp.int32)

    loss_fn = CrossEntropyL2(state_dict, m, l2_ratio)
    loss = jax.block_until_ready(loss_fn(y_pred, y_test))

    ref = _reference(y_pred, y_test, loss_fn.weights, m, l2_ratio)
    assert jnp.abs(loss - ref) < 1e-4, (loss, ref)

    print("KERNEL_OK")
</pallas_src>

<mosaic_0001>
module attributes {stable_mosaic.version = 11 : i64} {
  func.func @_loss_kernel(%arg0: i32, %arg1: i32, %arg2: memref<8x10xf32, #tpu.memory_space<vmem>>, %arg3: memref<8x1xi32, #tpu.memory_space<vmem>>, %arg4: memref<8x128xf32, #tpu.memory_space<vmem>>, %arg5: memref<1x1x1xf32, #tpu.memory_space<vmem>>, %arg6: memref<1x1xf32, #tpu.memory_space<vmem>>, %arg7: memref<1x128xf32, #tpu.memory_space<vmem>>) attributes {dimension_semantics = [#tpu.dimension_semantics<parallel>, #tpu.dimension_semantics<arbitrary>], iteration_bounds = array<i64: 2, 1>, scalar_prefetch = 0 : i64, scratch_operands = 2 : i64, tpu.core_type = #tpu.core_type<tc>, window_params = [{transform_indices = @transform_0, window_bounds = array<i64: 8, 10>}, {transform_indices = @transform_1, window_bounds = array<i64: 8, 1>}, {transform_indices = @transform_2, window_bounds = array<i64: 8, 128>}, {transform_indices = @transform_3, window_bounds = array<i64: 1, 1, 1>}]} {
    %c1_i32 = arith.constant 1 : i32
    %0 = arith.muli %arg0, %c1_i32 : i32
    %1 = arith.addi %0, %arg1 : i32
    %c0_i32 = arith.constant 0 : i32
    %2 = arith.cmpi eq, %arg1, %c0_i32 : i32
    %3 = arith.extui %2 : i1 to i32
    %c0_i32_0 = arith.constant 0 : i32
    %4 = arith.cmpi ne, %3, %c0_i32_0 : i32
    scf.if %4 {
      %cst = arith.constant 0.000000e+00 : f32
      %14 = vector.broadcast %cst : f32 to vector<1x1xf32>
      %c0 = arith.constant 0 : index
      %c0_7 = arith.constant 0 : index
      %15 = vector.load %arg6[%c0, %c0_7] : memref<1x1xf32, #tpu.memory_space<vmem>>, vector<1x1xf32>
      tpu.vector_store %arg6[%c0, %c0_7], %14 {strides = array<i32>} : memref<1x1xf32, #tpu.memory_space<vmem>>, vector<1x1xf32>,
      %cst_8 = arith.constant 0.000000e+00 : f32
      %16 = vector.broadcast %cst_8 : f32 to vector<1x128xf32>
      %c0_9 = arith.constant 0 : index
      %c0_10 = arith.constant 0 : index
      %17 = vector.load %arg7[%c0_9, %c0_10] : memref<1x128xf32, #tpu.memory_space<vmem>>, vector<1x128xf32>
      tpu.vector_store %arg7[%c0_9, %c0_10], %16 {strides = array<i32>} : memref<1x128xf32, #tpu.memory_space<vmem>>, vector<1x128xf32>,
    } else {
    }
    %c1_i32_1 = arith.constant 1 : i32
    %5 = arith.cmpi slt, %1, %c1_i32_1 : i32
    %6 = arith.extui %5 : i1 to i32
    %c0_i32_2 = arith.constant 0 : i32
    %7 = arith.cmpi ne, %6, %c0_i32_2 : i32
    scf.if %7 {
      %c0 = arith.constant 0 : index
      %c0_7 = arith.constant 0 : index
      %14 = vector.load %arg2[%c0, %c0_7] : memref<8x10xf32, #tpu.memory_space<vmem>>, vector<8x10xf32>
      %cst = arith.constant dense<0xFF800000> : vector<8xf32>
      %15 = vector.multi_reduction <maximumf>, %14, %cst [1] : vector<8x10xf32> to vector<8xf32>
      %16 = vector.shape_cast %15 : vector<8xf32> to vector<8x1xf32>
      %17 = vector.broadcast %16 : vector<8x1xf32> to vector<8x10xf32>
      %18 = arith.subf %14, %17 : vector<8x10xf32>
      %19 = math.exp %18 : vector<8x10xf32>
      %cst_8 = arith.constant dense<0.000000e+00> : vector<8xf32>
      %20 = vector.multi_reduction <add>, %19, %cst_8 [1] : vector<8x10xf32> to vector<8xf32>
      %21 = vector.shape_cast %20 : vector<8xf32> to vector<8x1xf32>
      %22 = math.log %21 : vector<8x1xf32>
      %c0_9 = arith.constant 0 : index
      %c0_10 = arith.constant 0 : index
      %23 = vector.load %arg3[%c0_9, %c0_10] : memref<8x1xi32, #tpu.memory_space<vmem>>, vector<8x1xi32>
      %24 = tpu.iota {dimensions = array<i32: 1>} : vector<8x10xi32>
      %25 = vector.broadcast %23 : vector<8x1xi32> to vector<8x10xi32>
      %26 = arith.cmpi eq, %24, %25 : vector<8x10xi32>
      %cst_11 = arith.constant 0.000000e+00 : f32
      %27 = vector.broadcast %cst_11 : f32 to vector<8x10xf32>
      %28 = arith.select %26, %18, %27 : vector<8x10xi1>, vector<8x10xf32>
      %cst_12 = arith.constant dense<0.000000e+00> : vector<8xf32>
      %29 = vector.multi_reduction <add>, %28, %cst_12 [1] : vector<8x10xf32> to vector<8xf32>
      %30 = vector.shape_cast %29 : vector<8xf32> to vector<8x1xf32>
      %31 = arith.subf %22, %30 : vector<8x1xf32>
      %c8_i32 = arith.constant 8 : i32
      %32 = arith.muli %1, %c8_i32 : i32
      %33 = tpu.iota {dimensions = array<i32: 0>} : vector<8x1xi32>
      %34 = vector.broadcast %32 : i32 to vector<8x1xi32>
      %35 = arith.addi %34, %33 : vector<8x1xi32>
      %c8_i32_13 = arith.constant 8 : i32
      %36 = vector.broadcast %c8_i32_13 : i32 to vector<8x1xi32>
      %37 = arith.cmpi slt, %35, %36 : vector<8x1xi32>
      %cst_14 = arith.constant 0.000000e+00 : f32
      %38 = vector.broadcast %cst_14 : f32 to vector<8x1xf32>
      %39 = arith.select %37, %31, %38 : vector<8x1xi1>, vector<8x1xf32>
      %c0_15 = arith.constant 0 : index
      %c0_16 = arith.constant 0 : index
      %40 = vector.load %arg6[%c0_15, %c0_16] : memref<1x1xf32, #tpu.memory_space<vmem>>, vector<1x1xf32>
      %cst_17 = arith.constant dense<0.000000e+00> : vector<1xf32>
      %41 = vector.multi_reduction <add>, %39, %cst_17 [0] : vector<8x1xf32> to vector<1xf32>
      %42 = vector.shape_cast %41 : vector<1xf32> to vector<1x1xf32>
      %43 = arith.addf %40, %42 : vector<1x1xf32>
      %c0_18 = arith.constant 0 : index
      %c0_19 = arith.constant 0 : index
      %44 = vector.load %arg6[%c0_18, %c0_19] : memref<1x1xf32, #tpu.memory_space<vmem>>, vector<1x1xf32>
      tpu.vector_store %arg6[%c0_18, %c0_19], %43 {strides = array<i32>} : memref<1x1xf32, #tpu.memory_space<vmem>>, vector<1x1xf32>,
    } else {
    }
    %c1_i32_3 = arith.constant 1 : i32
    %8 = arith.cmpi slt, %1, %c1_i32_3 : i32
    %9 = arith.extui %8 : i1 to i32
    %c0_i32_4 = arith.constant 0 : i32
    %10 = arith.cmpi ne, %9, %c0_i32_4 : i32
    scf.if %10 {
      %c0 = arith.constant 0 : index
      %c0_7 = arith.constant 0 : index
      %14 = vector.load %arg4[%c0, %c0_7] : memref<8x128xf32, #tpu.memory_space<vmem>>, vector<8x128xf32>
      %c0_8 = arith.constant 0 : index
      %c0_9 = arith.constant 0 : index
      %15 = vector.load %arg7[%c0_8, %c0_9] : memref<1x128xf32, #tpu.memory_space<vmem>>, vector<1x128xf32>
      %16 = arith.mulf %14, %14 : vector<8x128xf32>
      %cst = arith.constant dense<0.000000e+00> : vector<128xf32>
      %17 = vector.multi_reduction <add>, %16, %cst [0] : vector<8x128xf32> to vector<128xf32>
      %18 = vector.shape_cast %17 : vector<128xf32> to vector<1x128xf32>
      %19 = arith.addf %15, %18 : vector<1x128xf32>
      %c0_10 = arith.constant 0 : index
      %c0_11 = arith.constant 0 : index
      %20 = vector.load %arg7[%c0_10, %c0_11] : memref<1x128xf32, #tpu.memory_space<vmem>>, vector<1x128xf32>
      tpu.vector_store %arg7[%c0_10, %c0_11], %19 {strides = array<i32>} : memref<1x128xf32, #tpu.memory_space<vmem>>, vector<1x128xf32>,
    } else {
    }
    %c0_i32_5 = arith.constant 0 : i32
    %11 = arith.cmpi eq, %arg1, %c0_i32_5 : i32
    %12 = arith.extui %11 : i1 to i32
    %c0_i32_6 = arith.constant 0 : i32
    %13 = arith.cmpi ne, %12, %c0_i32_6 : i32
    scf.if %13 {
      %c0 = arith.constant 0 : index
      %c0_7 = arith.constant 0 : index
      %14 = vector.load %arg7[%c0, %c0_7] : memref<1x128xf32, #tpu.memory_space<vmem>>, vector<1x128xf32>
      %cst = arith.constant dense<0.000000e+00> : vector<1xf32>
      %15 = vector.multi_reduction <add>, %14, %cst [1] : vector<1x128xf32> to vector<1xf32>
      %16 = vector.shape_cast %15 : vector<1xf32> to vector<1x1xf32>
      %c0_8 = arith.constant 0 : index
      %c0_9 = arith.constant 0 : index
      %17 = vector.load %arg6[%c0_8, %c0_9] : memref<1x1xf32, #tpu.memory_space<vmem>>, vector<1x1xf32>
      %cst_10 = arith.constant 1.250000e-01 : f32
      %18 = vector.broadcast %cst_10 : f32 to vector<1x1xf32>
      %19 = arith.mulf %17, %18 : vector<1x1xf32>
      %cst_11 = arith.constant 5.000000e-06 : f32
      %20 = vector.broadcast %cst_11 : f32 to vector<1x1xf32>
      %21 = arith.mulf %20, %16 : vector<1x1xf32>
      %22 = arith.addf %19, %21 : vector<1x1xf32>
      %c0_12 = arith.constant 0 : index
      %c0_13 = arith.constant 0 : index
      %c0_14 = arith.constant 0 : index
      %23 = vector.load %arg5[%c0_12, %c0_13, %c0_14] : memref<1x1x1xf32, #tpu.memory_space<vmem>>, vector<1x1x1xf32>
      %24 = vector.shape_cast %23 : vector<1x1x1xf32> to vector<1x1xf32>
      %25 = vector.shape_cast %22 : vector<1x1xf32> to vector<1x1x1xf32>
      tpu.vector_store %arg5[%c0_12, %c0_13, %c0_14], %25 {strides = array<i32>} : memref<1x1x1xf32, #tpu.memory_space<vmem>>, vector<1x1x1xf32>,
    } else {
    }
    return
  }
  func.func @transform_0(%arg0: i32, %arg1: i32) -> (i32, i32) {
    %c1_i32 = arith.constant 1 : i32
    %0 = arith.muli %arg0, %c1_i32 : i32
    %1 = arith.addi %0, %arg1 : i32
    %c0_i32 = arith.constant 0 : i32
    %2 = arith.minsi %1, %c0_i32 : i32
    %c0_i32_0 = arith.constant 0 : i32
    %c0_i32_1 = arith.constant 0 : i32
    return %2, %c0_i32_0 : i32, i32
  }
  func.func @transform_1(%arg0: i32, %arg1: i32) -> (i32, i32) {
    %c1_i32 = arith.constant 1 : i32
    %0 = arith.muli %arg0, %c1_i32 : i32
    %1 = arith.addi %0, %arg1 : i32
    %c0_i32 = arith.constant 0 : i32
    %2 = arith.minsi %1, %c0_i32 : i32
    %c0_i32_0 = arith.constant 0 : i32
    %c0_i32_1 = arith.constant 0 : i32
    return %2, %c0_i32_0 : i32, i32
  }
  func.func @transform_2(%arg0: i32, %arg1: i32) -> (i32, i32) {
    %c1_i32 = arith.constant 1 : i32
    %0 = arith.muli %arg0, %c1_i32 : i32
    %1 = arith.addi %0, %arg1 : i32
    %c0_i32 = arith.constant 0 : i32
    %2 = arith.minsi %1, %c0_i32 : i32
    %c0_i32_0 = arith.constant 0 : i32
    %c0_i32_1 = arith.constant 0 : i32
    return %2, %c0_i32_0 : i32, i32
  }
  func.func @transform_3(%arg0: i32, %arg1: i32) -> (i32, i32, i32) {
    %c0_i32 = arith.constant 0 : i32
    %c0_i32_0 = arith.constant 0 : i32
    %c0_i32_1 = arith.constant 0 : i32
    return %arg0, %c0_i32, %c0_i32_0 : i32, i32, i32
  }
}

</mosaic_0001>

<bundles_post_ra>
// kernel: tpu_custom_call.1
= control target key start
LH: loop header
LB: loop body
LE: loop exit
PB: predicated region body
PF: predicated region fallthrough
CT: control target
= control target key end

     0   :  { %s529_s12 = smov 0   ;;  %s531_s13 = smov 0   ;;  %s590_s0 = inlined_call_operand.vmem [shape: f32[8,10], index: 0, kind: input, shape index: {}]   ;;  %s591_s1 = inlined_call_operand.vmem [shape: s32[8,1], index: 1, kind: input, shape index: {}]   ;;  %s592_s2 = inlined_call_operand.vmem [shape: f32[8,128], index: 2, kind: input, shape index: {}]   ;;  %s593_s3 = inlined_call_operand.vmem [shape: f32[2,1,1], index: 3, kind: output, shape index: {}]  }
   0x1   :  { %s533_s14 = smov 0  }
   0x2 LB: > { %s25_s15 = sadd.s32 1, %s501_s13  ;;  %p435_p0 = scmp.ge.s32.totalorder %s505_s14, 1  ;;  %s505_s14 = sphi %s533_s14, %s13_s14   ;;  %s501_s13 = sphi %s531_s13, %s595_s13   ;;  %s497_s12 = sphi %s529_s12, %s594_s12  }
   0x3   : > { %p27_p1 = scmp.ge.s32.totalorder %s25_s15, 2  ;;  %p202_p2 = scmp.lt.s32.totalorder %s505_s14, 3 }
   0x5   : > { %s597_s15 = smov (%p27_p1, %s25_s15), 0  ;;  %p203_p3 = pnand %p435_p0, %p202_p2 }
   0x6   : > { %p241_p4 = scmp.lt.s32.totalorder (!%p203_p3), %s497_s12, 0  ;;  %p270_p5 = scmp.lt.s32.totalorder (!%p203_p3), %s497_s12, 1  ;;  %vm278_vm0 = vcmask (!%p203_p3), 0   ;;  %v507_v0 = vmov (!%p203_p3), 0.0  }
   0x7   : > { %206 = sbr.rel (%p203_p3) target bundleno = 501 (0x1f5), region = 32  ;;  %279 = vst.msk [vmem:[#allocation2] sm:$0x1] (!%p203_p3), %vm278_vm0, %v507_v0  ;;  %280 = vst [vmem:[#allocation3] sm:$0x1] (!%p203_p3), %v507_v0  ;;  %p448_p6 = scmp.ge.s32.totalorder (!%p203_p3), %s497_s12, 1 }
   0xe   : > { %s242_s16 = scalar_select %p241_p4, %s497_s12, 0 }
   0xf   : > { %s554_s17 = scalar_select %p270_p5, %s497_s12, 1 }
  0x10   : > { %s599_s16 = smov (!%p241_p4, %s242_s16), 0  ;;  %284 = sbr.rel (%p448_p6) target bundleno = 352 (0x160), region = 40 }
  0x11   : > { %s272_s20 = scalar_lea.vmem %s593_s3, %s554_s17  ;;  %s439_s21 = sshll.u32 %s599_s16, 3  ;;  %vm286_vm1 = vcmask (!%p448_p6), 80896   ;;  %v508_v3 = vmov (!%p448_p6), 0   ;;  %v299_v8 = vlaneseq (!%p448_p6)  ;;  %v328_v23 = vld [vmem:[#allocation3] sm:$0x1] (!%p448_p6) }
  0x12   : > { %s246_s24 = scalar_lea.vmem %s590_s0, %s439_s21  ;;  %s256_s27 = scalar_lea.vmem %s591_s1, %s439_s21  ;;  %478 = vset.pattern.permute.xlu0 (!%p448_p6), %v508_v3  ;;  %v317_v39 = vld [vmem:[#allocation2] sm:$0x1] (!%p448_p6) }
  0x13   : > { %s266_s30 = scalar_lea.vmem %s592_s2, %s439_s21  ;;  %v285_v1 = vld [vmem:[%s246_s24] sm:$0xff] (!%p448_p6)  ;;  %v300_v9 = vand.u32 (!%p448_p6), 127, %v299_v8  ;;  %s449_s4 = sshll.u32 (!%p448_p6), %s497_s12, 3  ;;  %v312_v26 = vshrl.u32 (!%p448_p6), %v299_v8, 7 }
  0x14   : > { %v287_v2 = vsel (!%p448_p6), %vm286_vm1, %v285_v1, -inf  ;;  %v298_v4 = vld [vmem:[%s256_s27] sm:$0xff] (!%p448_p6)  ;;  %v313_v27 = vstv (!%p448_p6), %s449_s4 }
  0x15   : > { %288 = vmax.xlane.f32.xlu0 (!%p448_p6), %v287_v2  ;;  %v327_v15 = vld [vmem:[%s266_s30] sm:$0xff] (!%p448_p6)  ;;  %v314_v28 = vadd.s32 (!%p448_p6), %v313_v27, %v312_v26 }
  0x16   : > { %v329_v16 = vmul.f32 (!%p448_p6), %v327_v15, %v327_v15 }
  0x17   : > { %vm315_vm3 = vcmp.lt.s32.totalorder %v314_v28, 8 }
  0x18   : > { %v330_v17 = vrot.slane %v329_v16, 4 }
  0x1a   : > { %v331_v18 = vadd.f32 %v330_v17, %v329_v16 }
  0x1c   : > { %v332_v19 = vrot.slane %v331_v18, 2 }
  0x1e   : > { %v333_v20 = vadd.f32 %v332_v19, %v331_v18 }
  0x20   : > { %v334_v21 = vrot.slane %v333_v20, 1 }
  0x22   : > { %v335_v22 = vadd.f32 %v334_v21, %v333_v20 }
  0x24   : > { %v336_v24 = vadd.f32 %v335_v22, %v328_v23 }
  0x26   : > { %337 = vst [vmem:[#allocation3] sm:$0x1] %v336_v24 }
  0x2b   : > { %302 = vperm.xlu0 %478, %v298_v4  }
  0xa2   : > { %v289_v5 = vpop.xlane.xlu0 %288 }
  0xa3   : > { %v290_v6 = vsub.f32 %v285_v1, %v289_v5 }
  0xa5   : > { %v291_v7 = vmul.f32 1.442695, %v290_v6 }
  0xa7   : > { %479 = vpow2.f32 %v291_v7 }
  0xaa   : > { %v303_v10 = vpop.permute.xlu0 %302 }
  0xab   : > { %vm304_vm2 = vcmp.eq.s32.totalorder %v300_v9, %v303_v10 }
  0xac   : > { %v305_v13 = vsel %vm304_vm2, %v290_v6, 0.0 }
  0xad   : > { %v306_v14 = vsel %vm286_vm1, %v305_v13, 0.0 }
  0xb1   : > { %v480_v11 = vpop.eup %479 }
  0xb2   : > { %v293_v12 = vsel %vm286_vm1, %v480_v11, 0.0 }
  0xb3   : > { %294 = vadd.xlane.f32.xlu1 %v293_v12 }
  0xb7   : > { %307 = vadd.xlane.f32.xlu1 %v306_v14 }
 0x140   : > { %v295_v25 = vpop.xlane.xlu1 %294 }
 0x141   : > { %481 = vlog2.f32 %v295_v25 }
 0x144   : > { %v308_v31 = vpop.xlane.xlu1 %307 }
 0x14b   : > { %v482_v29 = vpop.eup %481 }
 0x14c   : > { %v297_v30 = vmul.f32 0.6931472, %v482_v29 }
 0x14e   : > { %v309_v32 = vsub.f32 %v297_v30, %v308_v31 }
 0x150   : > { %v316_v33 = vsel %vm315_vm3, %v309_v32, 0.0 }
 0x151   : > { %v318_v34 = vrot.slane %v316_v33, 4 }
 0x153   : > { %v319_v35 = vadd.f32 %v318_v34, %v316_v33 }
 0x155   : > { %v320_v36 = vrot.slane %v319_v35, 2 }
 0x157   : > { %v321_v37 = vadd.f32 %v320_v36, %v319_v35 }
 0x159   : > { %v322_v38 = vrot.slane %v321_v37, 1 }
 0x15b   : > { %v323_v40 = vadd.f32 %v322_v38, %v321_v37 }
 0x15d   : > { %v324_v41 = vadd.f32 %v323_v40, %v317_v39 }
 0x15f   : > { %326 = vst.msk [vmem:[#allocation2] sm:$0x1] %vm278_vm0, %v324_v41 }
 0x160 PF: > { %v341_v42 = vld [vmem:[#allocation3] sm:$0x1]  ;;  %vm342_vm4 = vcmask 1040384  }
 0x161   : > { %v343_v43 = vsel %vm342_vm4, %v341_v42, 0.0 }
 0x162   : > { %344 = vadd.xlane.f32.xlu0 %v343_v43 }
 0x166   : > { %v346_v44 = vld [vmem:[#allocation2] sm:$0x1] }
 0x167   : > { %v347_v45 = vmul.f32 0.125, %v346_v44 }
 0x1ef   : > { %v345_v46 = vpop.xlane.xlu0 %344 }
 0x1f0   : > { %v348_v47 = vmul.f32 5e-06, %v345_v46 }
 0x1f2   : > { %v349_v48 = vadd.f32 %v348_v47, %v347_v45 }
 0x1f4   : > { %351 = vst.msk [vmem:[%s272_s20] sm:$0x1] %vm278_vm0, %v349_v48 }
 0x1f5 PF: > { %s13_s14 = sadd.s32 1, %s505_s14   ;;  %s594_s12 = smov %s501_s13 }
 0x1f6   : > { %p10_p7 = scmp.ge.s32.totalorder %s13_s14, 4   ;;  %s595_s13 = smov %s597_s15 }
 0x1f8   :  { %12 = sbr.rel (!%p10_p7) target bundleno = 2 (0x2), region = 80 }

</bundles_post_ra>
